<compile_context>
chip_gen: v7x
topology: tpu7x:2x2x1
jax: 0.10.0
libtpu: 0.0.40
codegen_flags: <defaults>
</compile_context>

<pallas_src>
import jax
import jax.numpy as jnp
from jax.experimental import pallas as pl
from jax.experimental.pallas import tpu as pltpu


def _sublane_multiple(dtype) -> int:
    """Native sublane packing for the dtype (8 for 4B, 16 for 2B, 32 for 1B)."""
    itemsize = jnp.dtype(dtype).itemsize
    return {4: 8, 2: 16, 1: 32}.get(itemsize, 8)


def _vmem_capacity_bytes() -> int:
    """Per-core VMEM capacity; conservative 64 MiB (v7x) fallback."""
    try:
        info = pltpu.get_tpu_info()
        cap = getattr(info, "vmem_capacity_bytes", None)
        if cap:
            return int(cap)
    except Exception:
        pass
    return 64 << 20


def _make_pos_embedding_kernel(d_model: int, n: int, group: int):
    """Kernel replicating each embedding row `n` times along lanes.

    `group` copies are concatenated once into a lane-aligned chunk
    (group*d_model is a multiple of 128 whenever a divisor of n allows),
    then stored n//group times with plain full-lane stores — no full-width
    (ts, n*d_model) intermediate is ever materialized.
    """
    reps = n // group
    chunk_w = group * d_model

    def kernel(emb_ref, out_ref):
        emb = emb_ref[...]
        chunk = emb if group == 1 else jnp.concatenate([emb] * group, axis=-1)
        for j in range(reps):  # static unroll; each store is a direct vld->vst
            out_ref[:, j * chunk_w:(j + 1) * chunk_w] = chunk

    return kernel


def positional_encoding(x, emb_weight, *, target_tile_bytes=None):
    """Equivalent of PositionalEncoding.forward.

    x:          (S, N) integer array (only its shape matters, as in PyTorch)
    emb_weight: (max_len, d_model) embedding table
    returns:    (S, N, d_model) array of the table's dtype
    """
    S, N = x.shape
    max_len, d_model = emb_weight.shape
    if S > max_len:
        # PyTorch nn.Embedding would raise an index error; fail loudly too.
        raise ValueError(f"sequence length {S} exceeds max_len {max_len}")

    dtype = emb_weight.dtype
    itemsize = jnp.dtype(dtype).itemsize
    sub = _sublane_multiple(dtype)

    vmem_cap = _vmem_capacity_bytes()
    vmem_budget = (vmem_cap * 3) // 4  # headroom under the physical capacity

    # Generation-aware output-slab target: bigger slabs on 128 MiB-VMEM parts.
    if target_tile_bytes is None:
        target_tile_bytes = (16 << 20) if vmem_cap >= (96 << 20) else (8 << 20)

    bytes_per_row_out = N * d_model * itemsize
    # Double-buffered input + output tiles per sequence row.
    bytes_per_row_vmem = 2 * (d_model + N * d_model) * itemsize

    rows_target = max(sub, ((target_tile_bytes // bytes_per_row_out) // sub) * sub)
    rows_vmem = max(sub, ((vmem_budget // bytes_per_row_vmem) // sub) * sub)
    # Cap so the grid has >=2 steps when S allows (v7x megacore sharding).
    rows_two_steps = max(sub, pl.cdiv(pl.cdiv(S, 2), sub) * sub)

    ts = min(rows_target, rows_vmem, rows_two_steps)
    grid = (pl.cdiv(S, ts),)

    # Smallest grouping of replicas whose stored width is 128-lane aligned.
    group = N
    for g in range(1, N + 1):
        if N % g == 0 and (g * d_model) % 128 == 0:
            group = g
            break

    kernel = _make_pos_embedding_kernel(d_model, N, group)

    cost = pl.CostEstimate(
        flops=0,
        transcendentals=0,
        bytes_accessed=S * d_model * itemsize + S * N * d_model * itemsize,
    )

    out_flat = pl.pallas_call(
        kernel,
        out_shape=jax.ShapeDtypeStruct((S, N * d_model), dtype),
        grid_spec=pltpu.PrefetchScalarGridSpec(
            num_scalar_prefetch=0,
            grid=grid,
            # Full table passed; only the first cdiv(S, ts) blocks are DMA'd.
            in_specs=[pl.BlockSpec((ts, d_model), lambda i: (i, 0))],
            out_specs=pl.BlockSpec((ts, N * d_model), lambda i: (i, 0)),
        ),
        compiler_params=pltpu.CompilerParams(
            dimension_semantics=("parallel",),
            vmem_limit_bytes=int(max(vmem_budget, 32 << 20)),
        ),
        cost_estimate=cost,
    )(emb_weight)

    # Row-major (S, N*d_model) -> (S, N, d_model) is a free metadata reshape.
    return out_flat.reshape(S, N, d_model)


if __name__ == "__main__":
    key = jax.random.PRNGKey(0)
    k_w, k_x = jax.random.split(key)

    # Test 1: module-consistent small shapes (seq=8, batch=2, d_model=64).
    # d_model=64 exercises the "group copies to 128 lanes" path (group=2).
    S, N = 8, 2
    d_model, max_len = 64, 64
    emb_weight = jax.random.normal(k_w, (max_len, d_model), dtype=jnp.float32)
    # token ids; values are irrelevant (only the shape is used, as in PyTorch)
    x = jax.random.randint(k_x, (S, N), 0, 100, dtype=jnp.int32)

    out = jax.block_until_ready(positional_encoding(x, emb_weight))
    ref = jnp.broadcast_to(emb_weight[:S][:, None, :], (S, N, d_model))
    assert out.shape == (S, N, d_model), out.shape
    assert out.dtype == jnp.float32
    assert jnp.allclose(out, ref), "mismatch vs reference"

    # Test 2: d_model multiple of 128 (direct per-copy stores, group=1) plus a
    # ragged multi-step grid (S not a multiple of the tile size).
    S2, N2, d2 = 20, 2, 128
    emb2 = jax.random.normal(k_w, (64, d2), dtype=jnp.float32)
    x2 = jnp.zeros((S2, N2), dtype=jnp.int32)
    out2 = jax.block_until_ready(
        positional_encoding(x2, emb2, target_tile_bytes=4 * 1024))
    ref2 = jnp.broadcast_to(emb2[:S2][:, None, :], (S2, N2, d2))
    assert jnp.allclose(out2, ref2), "mismatch vs reference (tiled path)"

    print("KERNEL_OK")
</pallas_src>

<mosaic_0001>
module attributes {stable_mosaic.version = 11 : i64} {
  func.func @kernel(%arg0: i32, %arg1: memref<8x64xf32, #tpu.memory_space<vmem>>, %arg2: memref<8x128xf32, #tpu.memory_space<vmem>>) attributes {dimension_semantics = [#tpu.dimension_semantics<parallel>], iteration_bounds = array<i64: 1>, scalar_prefetch = 0 : i64, scratch_operands = 0 : i64, tpu.core_type = #tpu.core_type<tc>, window_params = [{transform_indices = @transform_0, window_bounds = array<i64: 8, 64>}, {transform_indices = @transform_1, window_bounds = array<i64: 8, 128>}]} {
    %c0 = arith.constant 0 : index
    %c0_0 = arith.constant 0 : index
    %0 = vector.load %arg1[%c0, %c0_0] : memref<8x64xf32, #tpu.memory_space<vmem>>, vector<8x64xf32>
    %1 = tpu.concatenate %0, %0 in 1 : vector<8x64xf32>, vector<8x64xf32> -> vector<8x128xf32>
    %c0_1 = arith.constant 0 : index
    %c0_2 = arith.constant 0 : index
    %2 = vector.load %arg2[%c0_1, %c0_2] : memref<8x128xf32, #tpu.memory_space<vmem>>, vector<8x128xf32>
    tpu.vector_store %arg2[%c0_1, %c0_2], %1 {strides = array<i32>} : memref<8x128xf32, #tpu.memory_space<vmem>>, vector<8x128xf32>,
    return
  }
  func.func @transform_0(%arg0: i32) -> (i32, i32) {
    %c0_i32 = arith.constant 0 : i32
    %c0_i32_0 = arith.constant 0 : i32
    return %arg0, %c0_i32 : i32, i32
  }
  func.func @transform_1(%arg0: i32) -> (i32, i32) {
    %c0_i32 = arith.constant 0 : i32
    %c0_i32_0 = arith.constant 0 : i32
    return %arg0, %c0_i32 : i32, i32
  }
}

</mosaic_0001>

<bundles_post_ra>
// kernel: tpu_custom_call.1
= control target key start
LH: loop header
LB: loop body
LE: loop exit
PB: predicated region body
PF: predicated region fallthrough
CT: control target
= control target key end

     0   :  { %6 = vsyncpa [#allocation3], 0  ;;  %s135_s0 = inlined_call_operand.hbm [shape: f32[64,64], index: 0, kind: input, shape index: {}]   ;;  %s136_s1 = inlined_call_operand.hbm [shape: f32[8,128], index: 1, kind: output, shape index: {}]  }
   0x1   :  { %7 = vsyncpa [#allocation4], 0  ;;  %s95_s6 = smov [#allocation2]   ;;  %s47_s10 = scalar_lea.hbm %s135_s0, 128 }
   0x2   :  { %s14_s7 = sshll.u32 %s95_s6, 4  ;;  %p48_p0 = scmp.ne.s32.totalorder %s135_s0, %s47_s10  ;;  %s15_s7 = int_to_ptr.vmem [resolvable:$true] %s14_s7 }
   0x3   :  { %s49_s15 = scalar_lea.hbm %s135_s0, 1024  ;;  %p51_p2 = scmp.lt.u32.totalorder %s47_s10, %s135_s0 }
   0x4   :  { %p50_p1 = scmp.lt.u32.totalorder %s49_s15, %s47_s10 }
   0x6   :  { %p52_p3 = por %p51_p2, %p50_p1 }
   0x8   :  { %p53_p4 = pnand %p52_p3, %p48_p0 }
   0xa   :  { %56 = shalt.err (!%p53_p4)
}
   0xb   :  { %s57_s18 = scalar_lea.vmem %s15_s7, 128  ;;  %p62_p6 = scmp.lt.s32.totalorder %s15_s7, %s15_s7 }
   0xc   :  { %p58_p5 = scmp.ne.s32.totalorder %s15_s7, %s57_s18  ;;  %p63_p7 = scmp.lt.s32.totalorder %s57_s18, %s57_s18 }
   0xe   :  { %p64_p8 = por %p63_p7, %p62_p6 }
  0x10   :  { %p65_p9 = pnand %p64_p8, %p58_p5 }
  0x12   :  { %68 = shalt.err (!%p65_p9)
}
  0x13   :  { %17 = dma.hbm_to_vmem [thread:$0]  %s135_s0, 128, %s15_s7, [#allocation3]  }
  0x14   :  { %91 = dma.done.wait [#allocation3], 128  }
  0x15   :  { %92 = vsyncadd [#allocation3], 4294967168  ;;  %v21_v0 = vld [vmem:[#allocation2] sm:$0xff]  ;;  %s96_s21 = smov 64   ;;  %s97_s22 = smov [#allocation5]   ;;  %vm26_vm0 = vcmask 523264  }
  0x16   :  { %23 = vrot.lane.b32.xlu0 %v21_v0, %s96_s21  ;;  %s35_s23 = sshll.u32 %s97_s22, 4  ;;  %s36_s23 = int_to_ptr.vmem [resolvable:$true] %s35_s23 }
  0x17   :  { %s69_s24 = scalar_lea.vmem %s36_s23, 128  ;;  %p74_p11 = scmp.lt.s32.totalorder %s36_s23, %s36_s23 }
  0x18   :  { %p70_p10 = scmp.ne.s32.totalorder %s36_s23, %s69_s24  ;;  %p75_p12 = scmp.lt.s32.totalorder %s69_s24, %s69_s24 }
  0x1a   :  { %p76_p13 = por %p75_p12, %p74_p11 }
  0x1c   :  { %p77_p0 = pnand %p76_p13, %p70_p10 }
  0x88   :  { %v24_v1 = vpop.permute.xlu0 %23 }
  0x89   :  { %v27_v2 = vsel %vm26_vm0, %v21_v0, %v24_v1 }
  0x8a   :  { %28 = vst [vmem:[#allocation5] sm:$0xff] %v27_v2 }
  0x8b   :  { %80 = shalt.err (!%p77_p0)
}
  0x8c   :  { %s81_s26 = scalar_lea.hbm %s136_s1, 128 }
  0x8d   :  { %p82_p1 = scmp.ne.s32.totalorder %s136_s1, %s81_s26  ;;  %p85_p2 = scmp.lt.u32.totalorder %s81_s26, %s136_s1 }
  0x8f   :  { %p87_p3 = pnand %p85_p2, %p82_p1 }
  0x91   :  { %90 = shalt.err (!%p87_p3)
}
  0x92   :  { %38 = dma.vmem_to_hbm [thread:$0]  %s36_s23, 128, %s136_s1, [#allocation4]  }
  0x93   :  { %93 = dma.done.wait [#allocation4], 128  }
  0x94   :  { %94 = vsyncadd [#allocation4], 4294967168 }
  0x95   :  { %42 = vsyncpa [#allocation3], 1 }
  0x96   :  { %43 = vsyncpa [#allocation4], 1 }

</bundles_post_ra>
